<compile_context>
chip_gen: v7x
topology: tpu7x:2x2x1
jax: 0.10.0
libtpu: 0.0.40
codegen_flags: <defaults>
</compile_context>

<pallas_src>
import jax
import jax.numpy as jnp
from jax.experimental import pallas as pl
from jax.experimental.pallas import tpu as pltpu

_LANES = 128


def _round_up(x: int, m: int) -> int:
    return ((x + m - 1) // m) * m


def _cdiv(a: int, b: int) -> int:
    return -(-a // b)


def _pixels_rgb_kernel(pix_ref, sat_ref, out_ref):
    # pix_ref/out_ref: (3, TM, 128); sat_ref: (TM, 128) -- all dense slabs.
    r = pix_ref[0].astype(jnp.float32)
    g = pix_ref[1].astype(jnp.float32)
    b = pix_ref[2].astype(jnp.float32)
    sat = sat_ref[...].astype(jnp.float32)
    mean = (r + g + b) * (1.0 / 3.0)            # per-pixel channel mean
    base = (1.0 - sat) * mean
    out_ref[0] = jnp.clip(r * sat + base, 0.0, 1.0).astype(out_ref.dtype)
    out_ref[1] = jnp.clip(g * sat + base, 0.0, 1.0).astype(out_ref.dtype)
    out_ref[2] = jnp.clip(b * sat + base, 0.0, 1.0).astype(out_ref.dtype)


def _choose_tiling(m_rows: int, tm_max: int):
    """Pick (TM, grid_n): TM multiple of 8 (or == m_rows), even grid for v7x."""
    num_blocks = _cdiv(m_rows, tm_max)
    if num_blocks == 1:
        # Only split a single block in two (v7x megacore) when each half keeps
        # >= 32 sublane rows of work; otherwise per-step overhead dominates.
        if m_rows >= 64:
            num_blocks = 2
    elif num_blocks % 2 == 1:
        num_blocks += 1  # balance work across the two v7x TensorCores
    if num_blocks == 1:
        return m_rows, 1
    tm = _round_up(_cdiv(m_rows, num_blocks), 8)
    if tm >= m_rows:
        return m_rows, 1
    return tm, _cdiv(m_rows, tm)


def pixels_rgb_forward(pixels: jax.Array, saturation: jax.Array,
                       *, tm_max: int = 4096) -> jax.Array:
    """Forward pass of PixelsRGB. pixels: (3, H, W), saturation: (1, H, W)."""
    C, H, W = pixels.shape
    assert C == 3 and saturation.shape == (1, H, W)

    n = H * W
    n_pad = _round_up(n, _LANES)
    m_rows = n_pad // _LANES

    pix_flat = pixels.reshape(3, n)
    sat_flat = saturation.reshape(1, n)
    if n_pad != n:
        # Ragged-tail fallback: pad inputs only (one extra pass).  Common image
        # resolutions have H*W % 128 == 0 and skip this entirely.
        pix_flat = jnp.pad(pix_flat, ((0, 0), (0, n_pad - n)))
        sat_flat = jnp.pad(sat_flat, ((0, 0), (0, n_pad - n)))
    pix3 = pix_flat.reshape(3, m_rows, _LANES)
    sat2 = sat_flat.reshape(m_rows, _LANES)

    tm, grid_n = _choose_tiling(m_rows, tm_max)

    # Exact double-buffered VMEM footprint: (3 pix + 1 sat + 3 out) dense slabs,
    # with the row count padded to a sublane multiple.
    itemsize = jnp.dtype(pixels.dtype).itemsize
    rows_pad = _round_up(tm, 8)
    vmem_needed = 2 * 7 * rows_pad * _LANES * itemsize   # 28 MiB at default TM
    vmem_limit = max(vmem_needed + (4 << 20), 16 << 20)

    out3 = pl.pallas_call(
        _pixels_rgb_kernel,
        out_shape=jax.ShapeDtypeStruct((3, m_rows, _LANES), pixels.dtype),
        grid_spec=pl.GridSpec(
            grid=(grid_n,),
            in_specs=[
                pl.BlockSpec((3, tm, _LANES), lambda i: (0, i, 0)),
                pl.BlockSpec((tm, _LANES), lambda i: (i, 0)),
            ],
            out_specs=pl.BlockSpec((3, tm, _LANES), lambda i: (0, i, 0)),
        ),
        compiler_params=pltpu.CompilerParams(
            dimension_semantics=("parallel",),
            vmem_limit_bytes=vmem_limit,
        ),
    )(pix3, sat2)

    out_flat = out3.reshape(3, n_pad)
    if n_pad != n:
        out_flat = out_flat[:, :n]
    return out_flat.reshape(3, H, W)


def init_pixels_rgb_params(key: jax.Array, resolution):
    """Deterministic parameter init matching the PyTorch __init__.

    resolution = (W, H); pixels ~ U(0,1)*0.05 + 0.475, shape (3, H, W);
    saturation same distribution, shape (1, H, W).
    """
    W, H = resolution
    k_pix, k_sat = jax.random.split(key)
    pixels = jax.random.uniform(k_pix, (3, H, W), jnp.float32) * 0.05 + 0.475
    saturation = jax.random.uniform(k_sat, (1, H, W), jnp.float32) * 0.05 + 0.475
    return pixels, saturation


def _reference_forward(pixels, saturation):
    mean = jnp.mean(pixels, axis=0, keepdims=True)
    return jnp.clip(pixels * saturation + (1.0 - saturation) * mean, 0.0, 1.0)


if __name__ == "__main__":
    key = jax.random.PRNGKey(0)
    # (W, H) resolutions: one hits the no-pad fast path (H*W % 128 == 0),
    # one ragged shape exercises the pad fallback.
    for idx, resolution in enumerate([(16, 16), (15, 17)]):
        pixels, saturation = init_pixels_rgb_params(
            jax.random.fold_in(key, idx), resolution)

        out = jax.block_until_ready(pixels_rgb_forward(pixels, saturation))

        ref = _reference_forward(pixels, saturation)
        assert out.shape == (3, resolution[1], resolution[0])
        assert out.dtype == jnp.float32
        assert jnp.allclose(out, ref, atol=1e-6, rtol=1e-6)

    # TODO(synk): blur() uses torchvision gaussian_blur and is not part of
    # forward(); not implemented here.
    print("KERNEL_OK")
</pallas_src>

<mosaic_0001>
module attributes {stable_mosaic.version = 11 : i64} {
  func.func @_pixels_rgb_kernel(%arg0: i32, %arg1: memref<3x2x128xf32, #tpu.memory_space<vmem>>, %arg2: memref<2x128xf32, #tpu.memory_space<vmem>>, %arg3: memref<3x2x128xf32, #tpu.memory_space<vmem>>) attributes {dimension_semantics = [#tpu.dimension_semantics<parallel>], iteration_bounds = array<i64: 1>, scalar_prefetch = 0 : i64, scratch_operands = 0 : i64, tpu.core_type = #tpu.core_type<tc>, window_params = [{transform_indices = @transform_0, window_bounds = array<i64: 3, 2, 128>}, {transform_indices = @transform_1, window_bounds = array<i64: 2, 128>}, {transform_indices = @transform_2, window_bounds = array<i64: 3, 2, 128>}]} {
    %c0 = arith.constant 0 : index
    %c0_0 = arith.constant 0 : index
    %c0_1 = arith.constant 0 : index
    %0 = vector.load %arg1[%c0, %c0_0, %c0_1] : memref<3x2x128xf32, #tpu.memory_space<vmem>>, vector<1x2x128xf32>
    %1 = vector.shape_cast %0 : vector<1x2x128xf32> to vector<2x128xf32>
    %c1 = arith.constant 1 : index
    %c0_2 = arith.constant 0 : index
    %c0_3 = arith.constant 0 : index
    %2 = vector.load %arg1[%c1, %c0_2, %c0_3] : memref<3x2x128xf32, #tpu.memory_space<vmem>>, vector<1x2x128xf32>
    %3 = vector.shape_cast %2 : vector<1x2x128xf32> to vector<2x128xf32>
    %c2 = arith.constant 2 : index
    %c0_4 = arith.constant 0 : index
    %c0_5 = arith.constant 0 : index
    %4 = vector.load %arg1[%c2, %c0_4, %c0_5] : memref<3x2x128xf32, #tpu.memory_space<vmem>>, vector<1x2x128xf32>
    %5 = vector.shape_cast %4 : vector<1x2x128xf32> to vector<2x128xf32>
    %c0_6 = arith.constant 0 : index
    %c0_7 = arith.constant 0 : index
    %6 = vector.load %arg2[%c0_6, %c0_7] : memref<2x128xf32, #tpu.memory_space<vmem>>, vector<2x128xf32>
    %7 = arith.addf %1, %3 : vector<2x128xf32>
    %8 = arith.addf %7, %5 : vector<2x128xf32>
    %cst = arith.constant 0.333333343 : f32
    %9 = vector.broadcast %cst : f32 to vector<2x128xf32>
    %10 = arith.mulf %8, %9 : vector<2x128xf32>
    %cst_8 = arith.constant 1.000000e+00 : f32
    %11 = vector.broadcast %cst_8 : f32 to vector<2x128xf32>
    %12 = arith.subf %11, %6 : vector<2x128xf32>
    %13 = arith.mulf %12, %10 : vector<2x128xf32>
    %14 = arith.mulf %1, %6 : vector<2x128xf32>
    %15 = arith.addf %14, %13 : vector<2x128xf32>
    %cst_9 = arith.constant 0.000000e+00 : f32
    %cst_10 = arith.constant 1.000000e+00 : f32
    %16 = vector.broadcast %cst_9 : f32 to vector<2x128xf32>
    %17 = arith.maximumf %16, %15 : vector<2x128xf32>
    %18 = vector.broadcast %cst_10 : f32 to vector<2x128xf32>
    %19 = arith.minimumf %18, %17 : vector<2x128xf32>
    %c0_11 = arith.constant 0 : index
    %c0_12 = arith.constant 0 : index
    %c0_13 = arith.constant 0 : index
    %20 = vector.load %arg3[%c0_11, %c0_12, %c0_13] : memref<3x2x128xf32, #tpu.memory_space<vmem>>, vector<1x2x128xf32>
    %21 = vector.shape_cast %20 : vector<1x2x128xf32> to vector<2x128xf32>
    %22 = vector.shape_cast %19 : vector<2x128xf32> to vector<1x2x128xf32>
    tpu.vector_store %arg3[%c0_11, %c0_12, %c0_13], %22 {strides = array<i32>} : memref<3x2x128xf32, #tpu.memory_space<vmem>>, vector<1x2x128xf32>,
    %23 = arith.mulf %3, %6 : vector<2x128xf32>
    %24 = arith.addf %23, %13 : vector<2x128xf32>
    %cst_14 = arith.constant 0.000000e+00 : f32
    %cst_15 = arith.constant 1.000000e+00 : f32
    %25 = vector.broadcast %cst_14 : f32 to vector<2x128xf32>
    %26 = arith.maximumf %25, %24 : vector<2x128xf32>
    %27 = vector.broadcast %cst_15 : f32 to vector<2x128xf32>
    %28 = arith.minimumf %27, %26 : vector<2x128xf32>
    %c1_16 = arith.constant 1 : index
    %c0_17 = arith.constant 0 : index
    %c0_18 = arith.constant 0 : index
    %29 = vector.load %arg3[%c1_16, %c0_17, %c0_18] : memref<3x2x128xf32, #tpu.memory_space<vmem>>, vector<1x2x128xf32>
    %30 = vector.shape_cast %29 : vector<1x2x128xf32> to vector<2x128xf32>
    %31 = vector.shape_cast %28 : vector<2x128xf32> to vector<1x2x128xf32>
    tpu.vector_store %arg3[%c1_16, %c0_17, %c0_18], %31 {strides = array<i32>} : memref<3x2x128xf32, #tpu.memory_space<vmem>>, vector<1x2x128xf32>,
    %32 = arith.mulf %5, %6 : vector<2x128xf32>
    %33 = arith.addf %32, %13 : vector<2x128xf32>
    %cst_19 = arith.constant 0.000000e+00 : f32
    %cst_20 = arith.constant 1.000000e+00 : f32
    %34 = vector.broadcast %cst_19 : f32 to vector<2x128xf32>
    %35 = arith.maximumf %34, %33 : vector<2x128xf32>
    %36 = vector.broadcast %cst_20 : f32 to vector<2x128xf32>
    %37 = arith.minimumf %36, %35 : vector<2x128xf32>
    %c2_21 = arith.constant 2 : index
    %c0_22 = arith.constant 0 : index
    %c0_23 = arith.constant 0 : index
    %38 = vector.load %arg3[%c2_21, %c0_22, %c0_23] : memref<3x2x128xf32, #tpu.memory_space<vmem>>, vector<1x2x128xf32>
    %39 = vector.shape_cast %38 : vector<1x2x128xf32> to vector<2x128xf32>
    %40 = vector.shape_cast %37 : vector<2x128xf32> to vector<1x2x128xf32>
    tpu.vector_store %arg3[%c2_21, %c0_22, %c0_23], %40 {strides = array<i32>} : memref<3x2x128xf32, #tpu.memory_space<vmem>>, vector<1x2x128xf32>,
    return
  }
  func.func @transform_0(%arg0: i32) -> (i32, i32, i32) {
    %c0_i32 = arith.constant 0 : i32
    %c0_i32_0 = arith.constant 0 : i32
    %c0_i32_1 = arith.constant 0 : i32
    return %c0_i32, %arg0, %c0_i32_0 : i32, i32, i32
  }
  func.func @transform_1(%arg0: i32) -> (i32, i32) {
    %c0_i32 = arith.constant 0 : i32
    %c0_i32_0 = arith.constant 0 : i32
    return %arg0, %c0_i32 : i32, i32
  }
  func.func @transform_2(%arg0: i32) -> (i32, i32, i32) {
    %c0_i32 = arith.constant 0 : i32
    %c0_i32_0 = arith.constant 0 : i32
    %c0_i32_1 = arith.constant 0 : i32
    return %c0_i32, %arg0, %c0_i32_0 : i32, i32, i32
  }
}

</mosaic_0001>

<bundles_post_ra>
// kernel: tpu_custom_call.1
= control target key start
LH: loop header
LB: loop body
LE: loop exit
PB: predicated region body
PF: predicated region fallthrough
CT: control target
= control target key end

     0   :  { %7 = vsyncpa [#allocation3], 0  ;;  %s175_s0 = inlined_call_operand.hbm [shape: f32[3,2,128], index: 0, kind: input, shape index: {}]   ;;  %s176_s1 = inlined_call_operand.vmem [shape: f32[2,128], index: 1, kind: input, shape index: {}]   ;;  %s177_s2 = inlined_call_operand.hbm [shape: f32[3,2,128], index: 2, kind: output, shape index: {}]  }
   0x1   :  { %8 = vsyncpa [#allocation4], 0  ;;  %s123_s9 = smov [#allocation2]   ;;  %s75_s13 = scalar_lea.hbm %s175_s0, 96 }
   0x2   :  { %s14_s10 = sshll.u32 %s123_s9, 4  ;;  %p76_p0 = scmp.ne.s32.totalorder %s175_s0, %s75_s13  ;;  %s15_s10 = int_to_ptr.vmem [resolvable:$true] %s14_s10 }
   0x3   :  { %p79_p1 = scmp.lt.u32.totalorder %s75_s13, %s175_s0 }
   0x5   :  { %p81_p2 = pnand %p79_p1, %p76_p0 }
   0x7   :  { %84 = shalt.err (!%p81_p2)
}
   0x8   :  { %s85_s18 = scalar_lea.vmem %s15_s10, 96  ;;  %p90_p4 = scmp.lt.s32.totalorder %s15_s10, %s15_s10 }
   0x9   :  { %p86_p3 = scmp.ne.s32.totalorder %s15_s10, %s85_s18  ;;  %p91_p5 = scmp.lt.s32.totalorder %s85_s18, %s85_s18 }
   0xb   :  { %p92_p6 = por %p91_p5, %p90_p4 }
   0xd   :  { %p93_p7 = pnand %p92_p6, %p86_p3 }
   0xf   :  { %96 = shalt.err (!%p93_p7)
}
  0x10   :  { %s124_s19 = smov 32   ;;  %s125_s20 = smov 2  }
  0x11   :  { %20 = dma.hbm_to_vmem [thread:$0]  %s175_s0, 96, %s15_s10, [#allocation3], %s124_s19, %s124_s19, %s125_s20  }
  0x12   :  { %119 = dma.done.wait [#allocation3], 96  }
  0x13   :  { %120 = vsyncadd [#allocation3], 4294967200  ;;  %v26_v0 = vld [vmem:[#allocation2] sm:$0x3]  ;;  %v28_v1 = vld [vmem:[#allocation2 + $0x2] sm:$0x3] }
  0x14   :  { %v30_v2 = vld [vmem:[#allocation2 + $0x4] sm:$0x3]  ;;  %v31_v3 = vld [vmem:[%s176_s1] sm:$0x3]  ;;  %v32_v4 = vadd.f32 %v28_v1, %v26_v0  ;;  %s126_s0 = smov [#allocation5]  }
  0x15   :  { %v35_v6 = vsub.f32 1.0, %v31_v3  ;;  %v37_v8 = vmul.f32 %v31_v3, %v26_v0  ;;  %v42_v9 = vmul.f32 %v31_v3, %v28_v1  ;;  %v48_v10 = vmul.f32 %v31_v3, %v30_v2  ;;  %s59_s25 = sshll.u32 %s126_s0, 4  ;;  %s60_s25 = int_to_ptr.vmem [resolvable:$true] %s59_s25 }
  0x16   :  { %v33_v5 = vadd.f32 %v32_v4, %v30_v2  ;;  %s97_s1 = scalar_lea.vmem %s60_s25, 96  ;;  %p102_p9 = scmp.lt.s32.totalorder %s60_s25, %s60_s25 }
  0x17   :  { %p98_p8 = scmp.ne.s32.totalorder %s60_s25, %s97_s1  ;;  %p103_p10 = scmp.lt.s32.totalorder %s97_s1, %s97_s1 }
  0x18   :  { %v34_v7 = vmul.f32 0.33333334, %v33_v5 }
  0x19   :  { %p104_p11 = por %p103_p10, %p102_p9 }
  0x1a   :  { %v36_v11 = vmul.f32 %v35_v6, %v34_v7 }
  0x1b   :  { %p105_p12 = pnand %p104_p11, %p98_p8 }
  0x1c   :  { %v38_v12 = vadd.f32 %v37_v8, %v36_v11  ;;  %v43_v13 = vadd.f32 %v42_v9, %v36_v11  ;;  %v49_v14 = vadd.f32 %v48_v10, %v36_v11 }
  0x1e   :  { %v39_v15 = vmax.f32 %v38_v12, 0.0  ;;  %v44_v16 = vmax.f32 %v43_v13, 0.0  ;;  %v50_v17 = vmax.f32 %v49_v14, 0.0 }
  0x20   :  { %v40_v18 = vmin.f32 %v39_v15, 1.0  ;;  %v45_v19 = vmin.f32 %v44_v16, 1.0  ;;  %v51_v20 = vmin.f32 %v50_v17, 1.0 }
  0x22   :  { %41 = vst [vmem:[#allocation5] sm:$0x3] %v40_v18  ;;  %47 = vst [vmem:[#allocation5 + $0x2] sm:$0x3] %v45_v19 }
  0x23   :  { %53 = vst [vmem:[#allocation5 + $0x4] sm:$0x3] %v51_v20 }
  0x24   :  { %108 = shalt.err (!%p105_p12)
}
  0x25   :  { %s109_s28 = scalar_lea.hbm %s177_s2, 96 }
  0x26   :  { %p110_p13 = scmp.ne.s32.totalorder %s177_s2, %s109_s28  ;;  %p113_p0 = scmp.lt.u32.totalorder %s109_s28, %s177_s2 }
  0x28   :  { %p115_p1 = pnand %p113_p0, %p110_p13 }
  0x2a   :  { %118 = shalt.err (!%p115_p1)
}
  0x2b   :  { %65 = dma.vmem_to_hbm [thread:$0]  %s60_s25, 96, %s177_s2, [#allocation4], %s124_s19, %s124_s19, %s125_s20  }
  0x2c   :  { %121 = dma.done.wait [#allocation4], 96  }
  0x2d   :  { %122 = vsyncadd [#allocation4], 4294967200 }
  0x2e   :  { %69 = vsyncpa [#allocation3], 1 }
  0x2f   :  { %70 = vsyncpa [#allocation4], 1 }

</bundles_post_ra>
